<compile_context>
chip_gen: v6e
topology: v6e:2x2x1
jax: 0.10.0
libtpu: 0.0.40
codegen_flags: <defaults>
</compile_context>

<pallas_src>
import functools

import jax
import jax.numpy as jnp
from jax.experimental import pallas as pl
from jax.experimental.pallas import tpu as pltpu


def _dropout_kernel(mask_ref, x_ref, o_ref, *, scale):
    # mask is 0/1 uint8; kept elements are rescaled by 1/(1-p).
    keep = mask_ref[...].astype(x_ref.dtype)
    o_ref[...] = x_ref[...] * keep * jnp.asarray(scale, dtype=x_ref.dtype)


def _round_up(n, m):
    return -(-n // m) * m


def dropout_mc(x, key, p, *, training=True, activate=False):
    """Pallas implementation of DropoutMC.forward."""
    if not (training or activate):
        return x
    if p <= 0.0:
        return x
    if p >= 1.0:
        return jnp.zeros_like(x)

    orig_shape = x.shape
    n = x.size

    COLS = 512                      # lane-dense width (multiple of 128)
    rows = -(-n // COLS)
    # Large row tiles for big inputs; for tiny inputs clamp to the (padded)
    # row count, kept a multiple of 32 so uint8 tiles stay layout-friendly.
    TM = 512 if rows >= 512 else _round_up(rows, 32)
    rows_pad = _round_up(rows, TM)
    n_pad = rows_pad * COLS

    xf = x.reshape(-1)
    if n_pad != n:
        xf = jnp.pad(xf, (0, n_pad - n))
    x2 = xf.reshape(rows_pad, COLS)

    keep_prob = 1.0 - float(p)
    mask = jax.random.bernoulli(key, keep_prob, (rows_pad, COLS)).astype(jnp.uint8)
    scale = 1.0 / keep_prob

    kernel = functools.partial(_dropout_kernel, scale=scale)

    out = pl.pallas_call(
        kernel,
        out_shape=jax.ShapeDtypeStruct((rows_pad, COLS), x.dtype),
        grid_spec=pltpu.PrefetchScalarGridSpec(
            num_scalar_prefetch=0,
            grid=(rows_pad // TM,),
            in_specs=[
                pl.BlockSpec((TM, COLS), lambda i: (i, 0)),   # keep mask
                pl.BlockSpec((TM, COLS), lambda i: (i, 0)),   # x
            ],
            out_specs=pl.BlockSpec((TM, COLS), lambda i: (i, 0)),
        ),
        compiler_params=pltpu.CompilerParams(
            dimension_semantics=("parallel",),
        ),
    )(mask, x2)

    return out.reshape(-1)[:n].reshape(orig_shape)


if __name__ == "__main__":
    root = jax.random.PRNGKey(0)
    kx, kmask = jax.random.split(root)

    B, S, H = 2, 8, 32
    x = jax.random.normal(kx, (B, S, H), dtype=jnp.float32)
    p = 0.05

    y = dropout_mc(x, kmask, p)     # module defaults: training mode -> dropout on
    y = jax.block_until_ready(y)

    # Every element must be either exactly dropped (0) or kept & rescaled by 1/(1-p).
    scale = 1.0 / (1.0 - p)
    kept = jnp.isclose(y, x * scale, rtol=1e-6, atol=1e-6)
    dropped = (y == 0.0)
    assert bool(jnp.all(kept | dropped)), "dropout must zero or rescale each element"
    assert bool(jnp.any(kept)), "expected some elements to be kept"
    assert y.shape == x.shape and y.dtype == x.dtype

    print("KERNEL_OK")
</pallas_src>

<mosaic_0001>
module attributes {stable_mosaic.version = 11 : i64} {
  func.func @_dropout_kernel(%arg0: i32, %arg1: memref<32x512xi8, #tpu.memory_space<vmem>>, %arg2: memref<32x512xf32, #tpu.memory_space<vmem>>, %arg3: memref<32x512xf32, #tpu.memory_space<vmem>>) attributes {dimension_semantics = [#tpu.dimension_semantics<parallel>], iteration_bounds = array<i64: 1>, scalar_prefetch = 0 : i64, scratch_operands = 0 : i64, tpu.core_type = #tpu.core_type<tc>, window_params = [{transform_indices = @transform_0, window_bounds = array<i64: 32, 512>}, {transform_indices = @transform_1, window_bounds = array<i64: 32, 512>}, {transform_indices = @transform_2, window_bounds = array<i64: 32, 512>}]} {
    %c0 = arith.constant 0 : index
    %c0_0 = arith.constant 0 : index
    %0 = vector.load %arg1[%c0, %c0_0] : memref<32x512xi8, #tpu.memory_space<vmem>>, vector<32x512xi8>
    %1 = arith.uitofp %0 : vector<32x512xi8> to vector<32x512xf32>
    %c0_1 = arith.constant 0 : index
    %c0_2 = arith.constant 0 : index
    %2 = vector.load %arg2[%c0_1, %c0_2] : memref<32x512xf32, #tpu.memory_space<vmem>>, vector<32x512xf32>
    %3 = arith.mulf %2, %1 : vector<32x512xf32>
    %cst = arith.constant 1.05263162 : f32
    %4 = vector.broadcast %cst : f32 to vector<32x512xf32>
    %5 = arith.mulf %3, %4 : vector<32x512xf32>
    %c0_3 = arith.constant 0 : index
    %c0_4 = arith.constant 0 : index
    %6 = vector.load %arg3[%c0_3, %c0_4] : memref<32x512xf32, #tpu.memory_space<vmem>>, vector<32x512xf32>
    tpu.vector_store %arg3[%c0_3, %c0_4], %5 {strides = array<i32>} : memref<32x512xf32, #tpu.memory_space<vmem>>, vector<32x512xf32>,
    return
  }
  func.func @transform_0(%arg0: i32) -> (i32, i32) {
    %c0_i32 = arith.constant 0 : i32
    %c0_i32_0 = arith.constant 0 : i32
    return %arg0, %c0_i32 : i32, i32
  }
  func.func @transform_1(%arg0: i32) -> (i32, i32) {
    %c0_i32 = arith.constant 0 : i32
    %c0_i32_0 = arith.constant 0 : i32
    return %arg0, %c0_i32 : i32, i32
  }
  func.func @transform_2(%arg0: i32) -> (i32, i32) {
    %c0_i32 = arith.constant 0 : i32
    %c0_i32_0 = arith.constant 0 : i32
    return %arg0, %c0_i32 : i32, i32
  }
}

</mosaic_0001>

<bundles_post_ra>
// kernel: tpu_custom_call.1
= control target key start
LH: loop header
LB: loop body
LE: loop exit
PB: predicated region body
PF: predicated region fallthrough
CT: control target
= control target key end

     0   :  { %7 = vsyncpa [#allocation3], 0  ;;  %s302_s0 = inlined_call_operand.hbm [shape: u8[32,512], index: 0, kind: input, shape index: {}]   ;;  %s303_s1 = inlined_call_operand.hbm [shape: f32[32,512], index: 1, kind: input, shape index: {}]   ;;  %s304_s2 = inlined_call_operand.hbm [shape: f32[32,512], index: 2, kind: output, shape index: {}]  }
   0x1   :  { %8 = vsyncpa [#allocation6], 0 }
   0x2   :  { %9 = vsyncpa [#allocation4], 0  ;;  %s243_s9 = smov [#allocation2]   ;;  %s244_s11 = smov [#allocation5]  }
   0x3   :  { %s16_s10 = sshll.u32 %s243_s9, 4  ;;  %s25_s12 = sshll.u32 %s244_s11, 4  ;;  %s17_s10 = int_to_ptr.vmem [resolvable:$true] %s16_s10  ;;  %s26_s12 = int_to_ptr.vmem [resolvable:$true] %s25_s12 }
   0x4   :  { %s185_s13 = scalar_lea.vmem %s17_s10, 512  ;;  %p190_p1 = scmp.lt.s32.totalorder %s17_s10, %s17_s10 }
   0x5   :  { %p186_p0 = scmp.ne.s32.totalorder %s17_s10, %s185_s13  ;;  %p191_p2 = scmp.lt.s32.totalorder %s185_s13, %s185_s13 }
   0x7   :  { %p192_p3 = por %p191_p2, %p190_p1 }
   0x9   :  { %p193_p4 = pnand %p192_p3, %p186_p0 }
   0xb   :  { %196 = shalt.err (!%p193_p4)
}
   0xc   :  { %19 = dma.hbm_to_vmem [thread:$0]  %s302_s0, 512, %s17_s10, [#allocation3]  }
   0xd   :  { %s205_s16 = scalar_lea.vmem %s26_s12, 2048  ;;  %p210_p6 = scmp.lt.s32.totalorder %s26_s12, %s26_s12 }
   0xe   :  { %p206_p5 = scmp.ne.s32.totalorder %s26_s12, %s205_s16  ;;  %p211_p7 = scmp.lt.s32.totalorder %s205_s16, %s205_s16 }
  0x10   :  { %p212_p8 = por %p211_p7, %p210_p6 }
  0x12   :  { %p213_p9 = pnand %p212_p8, %p206_p5 }
  0x14   :  { %216 = shalt.err (!%p213_p9)
}
  0x15   :  { %s245_s17 = smov 512   ;;  %s246_s18 = smov 32  }
  0x16   :  { %31 = dma.hbm_to_vmem [thread:$0]  %s303_s1, 2048, %s26_s12, [#allocation6], %s245_s17, %s245_s17, %s246_s18  }
  0x17   :  { %237 = dma.done.wait [#allocation3], 512  }
  0x18   :  { %238 = vsyncadd [#allocation3], 4294966784 }
  0x19   :  { %239 = dma.done.wait [#allocation6], 2048  }
  0x1a   :  { %240 = vsyncadd [#allocation6], 4294965248  ;;  %v272_v0 = vld [vmem:[#allocation2] sm:$0xff]  ;;  %v274_v1 = vld [vmem:[#allocation2 + $0x8] sm:$0xff]  ;;  %s247_s0 = smov [#allocation7]  }
  0x1b   :  { %v42_v2 = vunpack.c.0.s8 %v272_v0  ;;  %v43_v3 = vunpack.c.0.s8 %v274_v1  ;;  %v278_v4 = vld [vmem:[#allocation2 + $0x10] sm:$0xff]  ;;  %v46_v5 = vunpack.c.1.s8 %v272_v0  ;;  %v47_v6 = vunpack.c.1.s8 %v274_v1  ;;  %v283_v8 = vld [vmem:[#allocation2 + $0x18] sm:$0xff]  ;;  %v90_v16 = vld [vmem:[#allocation5] sm:$0xff]  ;;  %s159_s1 = sshll.u32 %s247_s0, 4  ;;  %s160_s1 = int_to_ptr.vmem [resolvable:$true] %s159_s1 }
  0x1c   :  { %v44_v7 = vunpack.c.0.s8 %v278_v4  ;;  %v48_v9 = vunpack.c.1.s8 %v278_v4  ;;  %v50_v10 = vunpack.c.2.s8 %v272_v0  ;;  %v51_v11 = vunpack.c.2.s8 %v274_v1  ;;  %v91_v17 = vld [vmem:[#allocation5 + $0x8] sm:$0xff]  ;;  %v94_v19 = vld [vmem:[#allocation5 + $0x20] sm:$0xff]  ;;  %v92_v25 = vld [vmem:[#allocation5 + $0x10] sm:$0xff]  ;;  %s217_s21 = scalar_lea.vmem %s160_s1, 2048  ;;  %p222_p11 = scmp.lt.s32.totalorder %s160_s1, %s160_s1 }
  0x1d   :  { %v58_v12 = vand.u32 255, %v42_v2  ;;  %v59_v13 = vand.u32 255, %v43_v3  ;;  %v45_v14 = vunpack.c.0.s8 %v283_v8  ;;  %v62_v15 = vand.u32 255, %v46_v5  ;;  %v95_v28 = vld [vmem:[#allocation5 + $0x28] sm:$0xff]  ;;  %v96_v29 = vld [vmem:[#allocation5 + $0x30] sm:$0xff]  ;;  %v93_v31 = vld [vmem:[#allocation5 + $0x18] sm:$0xff]  ;;  %p218_p10 = scmp.ne.s32.totalorder %s160_s1, %s217_s21  ;;  %p223_p12 = scmp.lt.s32.totalorder %s217_s21, %s217_s21 }
  0x1e   :  { %v60_v18 = vand.u32 255, %v44_v7  ;;  %v63_v20 = vand.u32 255, %v47_v6  ;;  %v64_v21 = vand.u32 255, %v48_v9  ;;  %v49_v22 = vunpack.c.1.s8 %v283_v8  ;;  %v97_v39 = vld [vmem:[#allocation5 + $0x38] sm:$0xff]  ;;  %v98_v57 = vld [vmem:[#allocation5 + $0x40] sm:$0xff]  ;;  %v99_v58 = vld [vmem:[#allocation5 + $0x48] sm:$0xff] }
  0x1f   :  { %v74_v23 = vcvt.s32.f32 %v58_v12  ;;  %v75_v24 = vcvt.s32.f32 %v59_v13  ;;  %v61_v26 = vand.u32 255, %v45_v14  ;;  %v78_v27 = vcvt.s32.f32 %v62_v15  ;;  %v100_v5 = vld [vmem:[#allocation5 + $0x50] sm:$0xff]  ;;  %v101_v14 = vld [vmem:[#allocation5 + $0x58] sm:$0xff]  ;;  %v103_v15 = vld [vmem:[#allocation5 + $0x68] sm:$0xff]  ;;  %p224_p13 = por %p223_p12, %p222_p11 }
  0x20   :  { %v76_v30 = vcvt.s32.f32 %v60_v18  ;;  %v79_v32 = vcvt.s32.f32 %v63_v20  ;;  %v80_v33 = vcvt.s32.f32 %v64_v21  ;;  %v65_v34 = vand.u32 255, %v49_v22 }
  0x21   :  { %v106_v35 = vmul.f32 %v90_v16, %v74_v23  ;;  %v107_v36 = vmul.f32 %v91_v17, %v75_v24  ;;  %v77_v37 = vcvt.s32.f32 %v61_v26  ;;  %v110_v38 = vmul.f32 %v94_v19, %v78_v27  ;;  %v104_v19 = vld [vmem:[#allocation5 + $0x70] sm:$0xff]  ;;  %v105_v24 = vld [vmem:[#allocation5 + $0x78] sm:$0xff]  ;;  %p225_p0 = pnand %p224_p13, %p218_p10 }
  0x22   :  { %v108_v40 = vmul.f32 %v92_v25, %v76_v30  ;;  %v111_v41 = vmul.f32 %v95_v28, %v79_v32  ;;  %v112_v42 = vmul.f32 %v96_v29, %v80_v33  ;;  %v81_v43 = vcvt.s32.f32 %v65_v34 }
  0x23   :  { %v122_v44 = vmul.f32 1.0526316, %v106_v35  ;;  %v123_v45 = vmul.f32 1.0526316, %v107_v36  ;;  %v109_v46 = vmul.f32 %v93_v31, %v77_v37  ;;  %v126_v47 = vmul.f32 1.0526316, %v110_v38 }
  0x24   :  { %v124_v48 = vmul.f32 1.0526316, %v108_v40  ;;  %v127_v49 = vmul.f32 1.0526316, %v111_v41  ;;  %v128_v50 = vmul.f32 1.0526316, %v112_v42  ;;  %v113_v51 = vmul.f32 %v97_v39, %v81_v43 }
  0x25   :  { %138 = vst [vmem:[#allocation7] sm:$0xff] %v122_v44  ;;  %139 = vst [vmem:[#allocation7 + $0x8] sm:$0xff] %v123_v45  ;;  %v125_v52 = vmul.f32 1.0526316, %v109_v46  ;;  %v66_v53 = vand.u32 255, %v50_v10  ;;  %v67_v54 = vand.u32 255, %v51_v11  ;;  %v52_v55 = vunpack.c.2.s8 %v278_v4 }
  0x26   :  { %142 = vst [vmem:[#allocation7 + $0x20] sm:$0xff] %v126_v47  ;;  %140 = vst [vmem:[#allocation7 + $0x10] sm:$0xff] %v124_v48  ;;  %v129_v56 = vmul.f32 1.0526316, %v113_v51  ;;  %v53_v59 = vunpack.c.2.s8 %v283_v8  ;;  %v54_v60 = vunpack.c.3.s8 %v272_v0  ;;  %v55_v61 = vunpack.c.3.s8 %v274_v1  ;;  %v102_v0 = vld [vmem:[#allocation5 + $0x60] sm:$0xff] }
  0x27   :  { %143 = vst [vmem:[#allocation7 + $0x28] sm:$0xff] %v127_v49  ;;  %144 = vst [vmem:[#allocation7 + $0x30] sm:$0xff] %v128_v50  ;;  %v82_v62 = vcvt.s32.f32 %v66_v53  ;;  %v83_v63 = vcvt.s32.f32 %v67_v54  ;;  %v68_v2 = vand.u32 255, %v52_v55  ;;  %v56_v3 = vunpack.c.3.s8 %v278_v4 }
  0x28   :  { %141 = vst [vmem:[#allocation7 + $0x18] sm:$0xff] %v125_v52  ;;  %145 = vst [vmem:[#allocation7 + $0x38] sm:$0xff] %v129_v56  ;;  %v69_v6 = vand.u32 255, %v53_v59  ;;  %v70_v7 = vand.u32 255, %v54_v60  ;;  %v71_v9 = vand.u32 255, %v55_v61  ;;  %v57_v10 = vunpack.c.3.s8 %v283_v8 }
  0x29   :  { %v114_v11 = vmul.f32 %v98_v57, %v82_v62  ;;  %v115_v12 = vmul.f32 %v99_v58, %v83_v63  ;;  %v84_v13 = vcvt.s32.f32 %v68_v2  ;;  %v72_v1 = vand.u32 255, %v56_v3 }
  0x2a   :  { %v85_v16 = vcvt.s32.f32 %v69_v6  ;;  %v86_v17 = vcvt.s32.f32 %v70_v7  ;;  %v87_v18 = vcvt.s32.f32 %v71_v9  ;;  %v73_v20 = vand.u32 255, %v57_v10 }
  0x2b   :  { %v130_v4 = vmul.f32 1.0526316, %v114_v11  ;;  %v131_v21 = vmul.f32 1.0526316, %v115_v12  ;;  %v116_v22 = vmul.f32 %v100_v5, %v84_v13  ;;  %v88_v23 = vcvt.s32.f32 %v72_v1 }
  0x2c   :  { %v117_v25 = vmul.f32 %v101_v14, %v85_v16  ;;  %v118_v26 = vmul.f32 %v102_v0, %v86_v17  ;;  %v119_v8 = vmul.f32 %v103_v15, %v87_v18  ;;  %v89_v27 = vcvt.s32.f32 %v73_v20 }
  0x2d   :  { %146 = vst [vmem:[#allocation7 + $0x40] sm:$0xff] %v130_v4  ;;  %147 = vst [vmem:[#allocation7 + $0x48] sm:$0xff] %v131_v21  ;;  %v132_v28 = vmul.f32 1.0526316, %v116_v22  ;;  %v120_v29 = vmul.f32 %v104_v19, %v88_v23 }
  0x2e   :  { %v133_v30 = vmul.f32 1.0526316, %v117_v25  ;;  %v134_v31 = vmul.f32 1.0526316, %v118_v26  ;;  %v135_v32 = vmul.f32 1.0526316, %v119_v8  ;;  %v121_v33 = vmul.f32 %v105_v24, %v89_v27 }
  0x2f   :  { %148 = vst [vmem:[#allocation7 + $0x50] sm:$0xff] %v132_v28  ;;  %v136_v34 = vmul.f32 1.0526316, %v120_v29 }
  0x30   :  { %149 = vst [vmem:[#allocation7 + $0x58] sm:$0xff] %v133_v30  ;;  %150 = vst [vmem:[#allocation7 + $0x60] sm:$0xff] %v134_v31  ;;  %v137_v35 = vmul.f32 1.0526316, %v121_v33 }
  0x31   :  { %151 = vst [vmem:[#allocation7 + $0x68] sm:$0xff] %v135_v32  ;;  %152 = vst [vmem:[#allocation7 + $0x70] sm:$0xff] %v136_v34 }
  0x32   :  { %153 = vst [vmem:[#allocation7 + $0x78] sm:$0xff] %v137_v35 }
  0x33   :  { %228 = shalt.err (!%p225_p0)
}
  0x34   :  { %165 = dma.vmem_to_hbm [thread:$0]  %s160_s1, 2048, %s304_s2, [#allocation4], %s245_s17, %s245_s17, %s246_s18  }
  0x35   :  { %241 = dma.done.wait [#allocation4], 2048  }
  0x36   :  { %242 = vsyncadd [#allocation4], 4294965248 }
  0x37   :  { %169 = vsyncpa [#allocation3], 1 }
  0x38   :  { %170 = vsyncpa [#allocation6], 1 }
  0x39   :  { %171 = vsyncpa [#allocation4], 1 }

</bundles_post_ra>
